<compile_context>
chip_gen: v5e
topology: v5e:2x2
jax: 0.10.0
libtpu: 0.0.40
codegen_flags: <defaults>
</compile_context>

<pallas_src>
import jax
import jax.numpy as jnp
from jax.experimental import pallas as pl
from jax.experimental.pallas import tpu as pltpu


_UNROLL_LAYER_LIMIT = 8  # beyond this, loop over layers to bound live ranges


def cross_interaction_kernel(x_ref, lw_t_ref, lb_ref, cw_ref, o_ref):
    # x_ref:    (TB, D)    input batch tile (native dtype)
    # lw_t_ref: (L, D, D)  linear weights, pre-transposed (W_i^T), matmul dtype
    # lb_ref:   (L, 1, D)  linear bias + scalar cross bias, folded (f32)
    # cw_ref:   (L, 1, D)  per-layer elementwise cross weights (f32)
    # o_ref:    (TB, D)    output batch tile (native dtype)
    x = x_ref[...].astype(jnp.float32)                       # (TB, D)
    num_layers = lw_t_ref.shape[0]
    mm_dtype = lw_t_ref.dtype

    def layer(i, x):
        xw = (x * cw_ref[i]).astype(mm_dtype)                # (TB, D) * (1, D)
        lin = jnp.dot(xw, lw_t_ref[i],
                      preferred_element_type=jnp.float32)    # MXU, f32 accum
        return lin + lb_ref[i] + x                           # bias + residual

    if num_layers <= _UNROLL_LAYER_LIMIT:
        for i in range(num_layers):                          # small, unrolled
            x = layer(i, x)
    else:
        # Deep stacks: bound live ranges with a real loop (dynamic first-axis
        # reads of the parameter refs are supported).
        x = jax.lax.fori_loop(0, num_layers, layer, x)

    o_ref[...] = x.astype(o_ref.dtype)


def _vmem_capacity_bytes():
    try:
        return int(pltpu.get_tpu_info().vmem_capacity_bytes)
    except Exception:
        return 64 * 1024 * 1024  # conservative default: v7x per-TC VMEM


def _choose_tile_b(B, D, L, x_itemsize, w_itemsize, tile_b):
    b_ceil8 = ((B + 7) // 8) * 8
    if tile_b is not None:
        tb = max(8, min(int(tile_b), 4096))
        tb = ((tb + 7) // 8) * 8              # multiple of 8 (BlockSpec rule)
        return min(tb, b_ceil8)

    vmem_cap = _vmem_capacity_bytes()
    budget = int(vmem_cap * 0.45)             # scoped-VMEM budget w/ headroom
    # Single-buffered replicated params: W^T + folded bias + cross weight.
    param_bytes = w_itemsize * L * D * D + 2 * 4 * L * D
    # Per-row cost: double-buffered in & out tiles in the native dtype plus
    # ~4 live (tile_b, D) f32 temporaries inside the layer loop.
    per_row = 4 * D * x_itemsize + 4 * D * 4
    avail = budget - param_bytes
    if avail < per_row * 256:
        # TODO(synk): if L*D*D alone blows the VMEM budget, add a K/N-tiling
        # grid axis with an f32 VMEM accumulator (or store weights in bf16)
        # instead of collapsing the batch tile into the tiny-tile regime.
        avail = per_row * 256
    tb = min(2048, avail // per_row)
    tb = max(8, (tb // 8) * 8)
    tb = min(tb, b_ceil8)
    # Pipeline depth: aim for >= 8 grid steps (>= 4 per TensorCore on v7x,
    # >= 3-4 on v5e/v6e) without dropping below ~512-row tiles.
    if b_ceil8 // tb < 8:
        per_step = ((b_ceil8 + 8 * 8 - 1) // (8 * 8)) * 8   # ceil(B/8) -> x8
        tb = min(tb, max(512, per_step))
        tb = max(8, min(tb, b_ceil8))
    return tb


def _replicated_spec(shape, single_buffer):
    ndim = len(shape)
    index_map = lambda i: (0,) * ndim
    if single_buffer and hasattr(pl, "Buffered"):
        try:
            # Constant index_map => double-buffering buys nothing; single
            # buffer halves the parameter VMEM footprint.
            return pl.BlockSpec(shape, index_map, pipeline_mode=pl.Buffered(1))
        except TypeError:
            pass
    return pl.BlockSpec(shape, index_map)


def cross_interaction_forward(x, lin_weights, lin_biases, cross_weights,
                              cross_biases, *, tile_b=None,
                              matmul_dtype=jnp.float32):
    """Forward pass of CrossInteractionLayer.

    x:             (B, D)
    lin_weights:   (L, D, D)   nn.Linear weights (out, in) per layer
    lin_biases:    (L, D)      nn.Linear biases per layer
    cross_weights: (L, D)      elementwise weight per layer
    cross_biases:  (L,) / (L,1) scalar bias per layer
    matmul_dtype:  dtype for the MXU matmul inputs (bf16 changes numerics;
                   keep the default f32 to match the PyTorch reference)
    returns:       (B, D) in x.dtype
    """
    B, D = x.shape
    L = lin_weights.shape[0]

    # --- parameter layout prep (wrapper-side, one-time) -------------------
    lw_t = jnp.transpose(lin_weights, (0, 2, 1)).astype(matmul_dtype)   # W_i^T
    # Fold the scalar cross bias into the linear bias (saves one VPU add
    # per element per layer and one kernel operand).
    lb = (lin_biases.astype(jnp.float32)
          + cross_biases.reshape(L, 1).astype(jnp.float32)).reshape(L, 1, D)
    cw = cross_weights.reshape(L, 1, D).astype(jnp.float32)

    x_itemsize = x.dtype.itemsize
    w_itemsize = jnp.dtype(matmul_dtype).itemsize

    tile_b = _choose_tile_b(B, D, L, x_itemsize, w_itemsize, tile_b)
    grid_b = pl.cdiv(B, tile_b)

    # Scoped-VMEM limit: single-buffered params + double-buffered x/out tiles
    # + in-kernel f32 temporaries, capped at half the physical per-core VMEM.
    vmem_cap = _vmem_capacity_bytes()
    param_bytes = w_itemsize * L * D * D + 2 * 4 * L * D
    est = (param_bytes
           + 4 * tile_b * D * x_itemsize       # double-buffered in + out tiles
           + 4 * tile_b * D * 4                # live f32 temporaries
           + (1 << 20))
    vmem_limit = int(min(max(2 * est, 32 << 20), vmem_cap // 2))
    if est > vmem_limit:
        vmem_limit = int(min(est + (1 << 20), vmem_cap))

    def _call(single_buffer_params):
        return pl.pallas_call(
            cross_interaction_kernel,
            out_shape=jax.ShapeDtypeStruct((B, D), x.dtype),
            grid=(grid_b,),
            in_specs=[
                pl.BlockSpec((tile_b, D), lambda i: (i, 0)),         # x tile
                _replicated_spec((L, D, D), single_buffer_params),   # W^T
                _replicated_spec((L, 1, D), single_buffer_params),   # bias
                _replicated_spec((L, 1, D), single_buffer_params),   # cross w
            ],
            out_specs=pl.BlockSpec((tile_b, D), lambda i: (i, 0)),
            compiler_params=pltpu.CompilerParams(
                dimension_semantics=("parallel",),
                vmem_limit_bytes=vmem_limit,
            ),
        )(x, lw_t, lb, cw)

    try:
        out = _call(True)
    except Exception:
        # Fallback if single-buffered (Buffered(1)) replicated operands are
        # not supported by this jax version / lowering.
        out = _call(False)
    return out


if __name__ == "__main__":
    B, D, L = 8, 32, 3  # batch_size, input_dim, num_layers

    key = jax.random.PRNGKey(0)
    k_lw, k_lb, k_cw, k_x = jax.random.split(key, 4)

    # Deterministic init mirroring the PyTorch module:
    #   nn.Linear(D, D): uniform(-1/sqrt(D), 1/sqrt(D)) weights and biases
    #   self.weight[i] = randn(D); self.bias[i] = zeros(1)
    bound = 1.0 / (D ** 0.5)
    lin_weights = jax.random.uniform(k_lw, (L, D, D), jnp.float32, -bound, bound)
    lin_biases = jax.random.uniform(k_lb, (L, D), jnp.float32, -bound, bound)
    cross_weights = jax.random.normal(k_cw, (L, D), jnp.float32)
    cross_biases = jnp.zeros((L, 1), jnp.float32)

    x = jax.random.normal(k_x, (B, D), jnp.float32)

    out = cross_interaction_forward(x, lin_weights, lin_biases,
                                    cross_weights, cross_biases)
    jax.block_until_ready(out)

    # Pure-JAX reference check.
    ref = x
    for i in range(L):
        ref = (ref * cross_weights[i]) @ lin_weights[i].T \
              + lin_biases[i] + cross_biases[i] + ref

    assert out.shape == (B, D)
    assert out.dtype == x.dtype
    assert jnp.allclose(out, ref, atol=1e-4, rtol=1e-4)

    print("KERNEL_OK")
</pallas_src>

<mosaic_0001>
module attributes {stable_mosaic.version = 11 : i64} {
  func.func @cross_interaction_kernel(%arg0: i32, %arg1: memref<8x32xf32, #tpu.memory_space<vmem>>, %arg2: memref<3x32x32xf32, #tpu.memory_space<vmem>>, %arg3: memref<3x1x32xf32, #tpu.memory_space<vmem>>, %arg4: memref<3x1x32xf32, #tpu.memory_space<vmem>>, %arg5: memref<8x32xf32, #tpu.memory_space<vmem>>) attributes {dimension_semantics = [#tpu.dimension_semantics<parallel>], iteration_bounds = array<i64: 1>, scalar_prefetch = 0 : i64, scratch_operands = 0 : i64, tpu.core_type = #tpu.core_type<tc>, window_params = [{transform_indices = @transform_0, window_bounds = array<i64: 8, 32>}, {pipeline_mode = #tpu.pipeline_mode<synchronous>, transform_indices = @transform_1, window_bounds = array<i64: 3, 32, 32>}, {pipeline_mode = #tpu.pipeline_mode<synchronous>, transform_indices = @transform_2, window_bounds = array<i64: 3, 1, 32>}, {pipeline_mode = #tpu.pipeline_mode<synchronous>, transform_indices = @transform_3, window_bounds = array<i64: 3, 1, 32>}, {transform_indices = @transform_4, window_bounds = array<i64: 8, 32>}]} {
    %c0 = arith.constant 0 : index
    %c0_0 = arith.constant 0 : index
    %0 = vector.load %arg1[%c0, %c0_0] : memref<8x32xf32, #tpu.memory_space<vmem>>, vector<8x32xf32>
    %c0_1 = arith.constant 0 : index
    %c0_2 = arith.constant 0 : index
    %c0_3 = arith.constant 0 : index
    %1 = vector.load %arg4[%c0_1, %c0_2, %c0_3] : memref<3x1x32xf32, #tpu.memory_space<vmem>>, vector<1x1x32xf32>
    %2 = vector.shape_cast %1 : vector<1x1x32xf32> to vector<1x32xf32>
    %3 = vector.broadcast %2 : vector<1x32xf32> to vector<8x32xf32>
    %4 = arith.mulf %0, %3 : vector<8x32xf32>
    %c0_4 = arith.constant 0 : index
    %c0_5 = arith.constant 0 : index
    %c0_6 = arith.constant 0 : index
    %5 = vector.load %arg2[%c0_4, %c0_5, %c0_6] : memref<3x32x32xf32, #tpu.memory_space<vmem>>, vector<1x32x32xf32>
    %6 = vector.shape_cast %5 : vector<1x32x32xf32> to vector<32x32xf32>
    %cst = arith.constant dense<0.000000e+00> : vector<8x32xf32>
    %7 = tpu.matmul %4, %6, %cst {dimension_numbers = #tpu.dot_dimension_numbers<[1], [0], [0], [1], [0, 0, 1, 1], [], []>} : vector<8x32xf32>, vector<32x32xf32>, vector<8x32xf32> -> vector<8x32xf32>
    %c0_7 = arith.constant 0 : index
    %c0_8 = arith.constant 0 : index
    %c0_9 = arith.constant 0 : index
    %8 = vector.load %arg3[%c0_7, %c0_8, %c0_9] : memref<3x1x32xf32, #tpu.memory_space<vmem>>, vector<1x1x32xf32>
    %9 = vector.shape_cast %8 : vector<1x1x32xf32> to vector<1x32xf32>
    %10 = vector.broadcast %9 : vector<1x32xf32> to vector<8x32xf32>
    %11 = arith.addf %7, %10 : vector<8x32xf32>
    %12 = arith.addf %11, %0 : vector<8x32xf32>
    %c1 = arith.constant 1 : index
    %c0_10 = arith.constant 0 : index
    %c0_11 = arith.constant 0 : index
    %13 = vector.load %arg4[%c1, %c0_10, %c0_11] : memref<3x1x32xf32, #tpu.memory_space<vmem>>, vector<1x1x32xf32>
    %14 = vector.shape_cast %13 : vector<1x1x32xf32> to vector<1x32xf32>
    %15 = vector.broadcast %14 : vector<1x32xf32> to vector<8x32xf32>
    %16 = arith.mulf %12, %15 : vector<8x32xf32>
    %c1_12 = arith.constant 1 : index
    %c0_13 = arith.constant 0 : index
    %c0_14 = arith.constant 0 : index
    %17 = vector.load %arg2[%c1_12, %c0_13, %c0_14] : memref<3x32x32xf32, #tpu.memory_space<vmem>>, vector<1x32x32xf32>
    %18 = vector.shape_cast %17 : vector<1x32x32xf32> to vector<32x32xf32>
    %cst_15 = arith.constant dense<0.000000e+00> : vector<8x32xf32>
    %19 = tpu.matmul %16, %18, %cst_15 {dimension_numbers = #tpu.dot_dimension_numbers<[1], [0], [0], [1], [0, 0, 1, 1], [], []>} : vector<8x32xf32>, vector<32x32xf32>, vector<8x32xf32> -> vector<8x32xf32>
    %c1_16 = arith.constant 1 : index
    %c0_17 = arith.constant 0 : index
    %c0_18 = arith.constant 0 : index
    %20 = vector.load %arg3[%c1_16, %c0_17, %c0_18] : memref<3x1x32xf32, #tpu.memory_space<vmem>>, vector<1x1x32xf32>
    %21 = vector.shape_cast %20 : vector<1x1x32xf32> to vector<1x32xf32>
    %22 = vector.broadcast %21 : vector<1x32xf32> to vector<8x32xf32>
    %23 = arith.addf %19, %22 : vector<8x32xf32>
    %24 = arith.addf %23, %12 : vector<8x32xf32>
    %c2 = arith.constant 2 : index
    %c0_19 = arith.constant 0 : index
    %c0_20 = arith.constant 0 : index
    %25 = vector.load %arg4[%c2, %c0_19, %c0_20] : memref<3x1x32xf32, #tpu.memory_space<vmem>>, vector<1x1x32xf32>
    %26 = vector.shape_cast %25 : vector<1x1x32xf32> to vector<1x32xf32>
    %27 = vector.broadcast %26 : vector<1x32xf32> to vector<8x32xf32>
    %28 = arith.mulf %24, %27 : vector<8x32xf32>
    %c2_21 = arith.constant 2 : index
    %c0_22 = arith.constant 0 : index
    %c0_23 = arith.constant 0 : index
    %29 = vector.load %arg2[%c2_21, %c0_22, %c0_23] : memref<3x32x32xf32, #tpu.memory_space<vmem>>, vector<1x32x32xf32>
    %30 = vector.shape_cast %29 : vector<1x32x32xf32> to vector<32x32xf32>
    %cst_24 = arith.constant dense<0.000000e+00> : vector<8x32xf32>
    %31 = tpu.matmul %28, %30, %cst_24 {dimension_numbers = #tpu.dot_dimension_numbers<[1], [0], [0], [1], [0, 0, 1, 1], [], []>} : vector<8x32xf32>, vector<32x32xf32>, vector<8x32xf32> -> vector<8x32xf32>
    %c2_25 = arith.constant 2 : index
    %c0_26 = arith.constant 0 : index
    %c0_27 = arith.constant 0 : index
    %32 = vector.load %arg3[%c2_25, %c0_26, %c0_27] : memref<3x1x32xf32, #tpu.memory_space<vmem>>, vector<1x1x32xf32>
    %33 = vector.shape_cast %32 : vector<1x1x32xf32> to vector<1x32xf32>
    %34 = vector.broadcast %33 : vector<1x32xf32> to vector<8x32xf32>
    %35 = arith.addf %31, %34 : vector<8x32xf32>
    %36 = arith.addf %35, %24 : vector<8x32xf32>
    %c0_28 = arith.constant 0 : index
    %c0_29 = arith.constant 0 : index
    %37 = vector.load %arg5[%c0_28, %c0_29] : memref<8x32xf32, #tpu.memory_space<vmem>>, vector<8x32xf32>
    tpu.vector_store %arg5[%c0_28, %c0_29], %36 {strides = array<i32>} : memref<8x32xf32, #tpu.memory_space<vmem>>, vector<8x32xf32>,
    return
  }
  func.func @transform_0(%arg0: i32) -> (i32, i32) {
    %c0_i32 = arith.constant 0 : i32
    %c0_i32_0 = arith.constant 0 : i32
    return %arg0, %c0_i32 : i32, i32
  }
  func.func @transform_1(%arg0: i32) -> (i32, i32, i32) {
    %c0_i32 = arith.constant 0 : i32
    %c0_i32_0 = arith.constant 0 : i32
    %c0_i32_1 = arith.constant 0 : i32
    %c0_i32_2 = arith.constant 0 : i32
    return %c0_i32, %c0_i32_0, %c0_i32_1 : i32, i32, i32
  }
  func.func @transform_2(%arg0: i32) -> (i32, i32, i32) {
    %c0_i32 = arith.constant 0 : i32
    %c0_i32_0 = arith.constant 0 : i32
    %c0_i32_1 = arith.constant 0 : i32
    %c0_i32_2 = arith.constant 0 : i32
    return %c0_i32, %c0_i32_0, %c0_i32_1 : i32, i32, i32
  }
  func.func @transform_3(%arg0: i32) -> (i32, i32, i32) {
    %c0_i32 = arith.constant 0 : i32
    %c0_i32_0 = arith.constant 0 : i32
    %c0_i32_1 = arith.constant 0 : i32
    %c0_i32_2 = arith.constant 0 : i32
    return %c0_i32, %c0_i32_0, %c0_i32_1 : i32, i32, i32
  }
  func.func @transform_4(%arg0: i32) -> (i32, i32) {
    %c0_i32 = arith.constant 0 : i32
    %c0_i32_0 = arith.constant 0 : i32
    return %arg0, %c0_i32 : i32, i32
  }
}

module attributes {stable_mosaic.version = 11 : i64} {
  func.func @cross_interaction_kernel(%arg0: i32, %arg1: memref<8x32xf32, #tpu.memory_space<vmem>>, %arg2: memref<3x32x32xf32, #tpu.memory_space<vmem>>, %arg3: memref<3x1x32xf32, #tpu.memory_space<vmem>>, %arg4: memref<3x1x32xf32, #tpu.memory_space<vmem>>, %arg5: memref<8x32xf32, #tpu.memory_space<vmem>>) attributes {dimension_semantics = [#tpu.dimension_semantics<parallel>], iteration_bounds = array<i64: 1>, scalar_prefetch = 0 : i64, scratch_operands = 0 : i64, tpu.core_type = #tpu.core_type<tc>, window_params = [{transform_indices = @transform_0, window_bounds = array<i64: 8, 32>}, {pipeline_mode = #tpu.pipeline_mode<synchronous>, transform_indices = @transform_1, window_bounds = array<i64: 3, 32, 32>}, {pipeline_mode = #tpu.pipeline_mode<synchronous>, transform_indices = @transform_2, window_bounds = array<i64: 3, 1, 32>}, {pipeline_mode = #tpu.pipeline_mode<synchronous>, transform_indices = @transform_3, window_bounds = array<i64: 3, 1, 32>}, {transform_indices = @transform_4, window_bounds = array<i64: 8, 32>}]} {
    %c0 = arith.constant 0 : index
    %c0_0 = arith.constant 0 : index
    %0 = vector.load %arg1[%c0, %c0_0] : memref<8x32xf32, #tpu.memory_space<vmem>>, vector<8x32xf32>
    %c0_1 = arith.constant 0 : index
    %c0_2 = arith.constant 0 : index
    %c0_3 = arith.constant 0 : index
    %1 = vector.load %arg4[%c0_1, %c0_2, %c0_3] : memref<3x1x32xf32, #tpu.memory_space<vmem>>, vector<1x1x32xf32>
    %2 = vector.shape_cast %1 : vector<1x1x32xf32> to vector<1x32xf32>
    %3 = vector.broadcast %2 : vector<1x32xf32> to vector<8x32xf32>
    %4 = arith.mulf %0, %3 : vector<8x32xf32>
    %c0_4 = arith.constant 0 : index
    %c0_5 = arith.constant 0 : index
    %c0_6 = arith.constant 0 : index
    %5 = vector.load %arg2[%c0_4, %c0_5, %c0_6] : memref<3x32x32xf32, #tpu.memory_space<vmem>>, vector<1x32x32xf32>
    %6 = vector.shape_cast %5 : vector<1x32x32xf32> to vector<32x32xf32>
    %cst = arith.constant dense<0.000000e+00> : vector<8x32xf32>
    %7 = tpu.matmul %4, %6, %cst {dimension_numbers = #tpu.dot_dimension_numbers<[1], [0], [0], [1], [0, 0, 1, 1], [], []>} : vector<8x32xf32>, vector<32x32xf32>, vector<8x32xf32> -> vector<8x32xf32>
    %c0_7 = arith.constant 0 : index
    %c0_8 = arith.constant 0 : index
    %c0_9 = arith.constant 0 : index
    %8 = vector.load %arg3[%c0_7, %c0_8, %c0_9] : memref<3x1x32xf32, #tpu.memory_space<vmem>>, vector<1x1x32xf32>
    %9 = vector.shape_cast %8 : vector<1x1x32xf32> to vector<1x32xf32>
    %10 = vector.broadcast %9 : vector<1x32xf32> to vector<8x32xf32>
    %11 = arith.addf %7, %10 : vector<8x32xf32>
    %12 = arith.addf %11, %0 : vector<8x32xf32>
    %c1 = arith.constant 1 : index
    %c0_10 = arith.constant 0 : index
    %c0_11 = arith.constant 0 : index
    %13 = vector.load %arg4[%c1, %c0_10, %c0_11] : memref<3x1x32xf32, #tpu.memory_space<vmem>>, vector<1x1x32xf32>
    %14 = vector.shape_cast %13 : vector<1x1x32xf32> to vector<1x32xf32>
    %15 = vector.broadcast %14 : vector<1x32xf32> to vector<8x32xf32>
    %16 = arith.mulf %12, %15 : vector<8x32xf32>
    %c1_12 = arith.constant 1 : index
    %c0_13 = arith.constant 0 : index
    %c0_14 = arith.constant 0 : index
    %17 = vector.load %arg2[%c1_12, %c0_13, %c0_14] : memref<3x32x32xf32, #tpu.memory_space<vmem>>, vector<1x32x32xf32>
    %18 = vector.shape_cast %17 : vector<1x32x32xf32> to vector<32x32xf32>
    %cst_15 = arith.constant dense<0.000000e+00> : vector<8x32xf32>
    %19 = tpu.matmul %16, %18, %cst_15 {dimension_numbers = #tpu.dot_dimension_numbers<[1], [0], [0], [1], [0, 0, 1, 1], [], []>} : vector<8x32xf32>, vector<32x32xf32>, vector<8x32xf32> -> vector<8x32xf32>
    %c1_16 = arith.constant 1 : index
    %c0_17 = arith.constant 0 : index
    %c0_18 = arith.constant 0 : index
    %20 = vector.load %arg3[%c1_16, %c0_17, %c0_18] : memref<3x1x32xf32, #tpu.memory_space<vmem>>, vector<1x1x32xf32>
    %21 = vector.shape_cast %20 : vector<1x1x32xf32> to vector<1x32xf32>
    %22 = vector.broadcast %21 : vector<1x32xf32> to vector<8x32xf32>
    %23 = arith.addf %19, %22 : vector<8x32xf32>
    %24 = arith.addf %23, %12 : vector<8x32xf32>
    %c2 = arith.constant 2 : index
    %c0_19 = arith.constant 0 : index
    %c0_20 = arith.constant 0 : index
    %25 = vector.load %arg4[%c2, %c0_19, %c0_20] : memref<3x1x32xf32, #tpu.memory_space<vmem>>, vector<1x1x32xf32>
    %26 = vector.shape_cast %25 : vector<1x1x32xf32> to vector<1x32xf32>
    %27 = vector.broadcast %26 : vector<1x32xf32> to vector<8x32xf32>
    %28 = arith.mulf %24, %27 : vector<8x32xf32>
    %c2_21 = arith.constant 2 : index
    %c0_22 = arith.constant 0 : index
    %c0_23 = arith.constant 0 : index
    %29 = vector.load %arg2[%c2_21, %c0_22, %c0_23] : memref<3x32x32xf32, #tpu.memory_space<vmem>>, vector<1x32x32xf32>
    %30 = vector.shape_cast %29 : vector<1x32x32xf32> to vector<32x32xf32>
    %cst_24 = arith.constant dense<0.000000e+00> : vector<8x32xf32>
    %31 = tpu.matmul %28, %30, %cst_24 {dimension_numbers = #tpu.dot_dimension_numbers<[1], [0], [0], [1], [0, 0, 1, 1], [], []>} : vector<8x32xf32>, vector<32x32xf32>, vector<8x32xf32> -> vector<8x32xf32>
    %c2_25 = arith.constant 2 : index
    %c0_26 = arith.constant 0 : index
    %c0_27 = arith.constant 0 : index
    %32 = vector.load %arg3[%c2_25, %c0_26, %c0_27] : memref<3x1x32xf32, #tpu.memory_space<vmem>>, vector<1x1x32xf32>
    %33 = vector.shape_cast %32 : vector<1x1x32xf32> to vector<1x32xf32>
    %34 = vector.broadcast %33 : vector<1x32xf32> to vector<8x32xf32>
    %35 = arith.addf %31, %34 : vector<8x32xf32>
    %36 = arith.addf %35, %24 : vector<8x32xf32>
    %c0_28 = arith.constant 0 : index
    %c0_29 = arith.constant 0 : index
    %37 = vector.load %arg5[%c0_28, %c0_29] : memref<8x32xf32, #tpu.memory_space<vmem>>, vector<8x32xf32>
    tpu.vector_store %arg5[%c0_28, %c0_29], %36 {strides = array<i32>} : memref<8x32xf32, #tpu.memory_space<vmem>>, vector<8x32xf32>,
    return
  }
  func.func @transform_0(%arg0: i32) -> (i32, i32) {
    %c0_i32 = arith.constant 0 : i32
    %c0_i32_0 = arith.constant 0 : i32
    return %arg0, %c0_i32 : i32, i32
  }
  func.func @transform_1(%arg0: i32) -> (i32, i32, i32) {
    %c0_i32 = arith.constant 0 : i32
    %c0_i32_0 = arith.constant 0 : i32
    %c0_i32_1 = arith.constant 0 : i32
    %c0_i32_2 = arith.constant 0 : i32
    return %c0_i32, %c0_i32_0, %c0_i32_1 : i32, i32, i32
  }
  func.func @transform_2(%arg0: i32) -> (i32, i32, i32) {
    %c0_i32 = arith.constant 0 : i32
    %c0_i32_0 = arith.constant 0 : i32
    %c0_i32_1 = arith.constant 0 : i32
    %c0_i32_2 = arith.constant 0 : i32
    return %c0_i32, %c0_i32_0, %c0_i32_1 : i32, i32, i32
  }
  func.func @transform_3(%arg0: i32) -> (i32, i32, i32) {
    %c0_i32 = arith.constant 0 : i32
    %c0_i32_0 = arith.constant 0 : i32
    %c0_i32_1 = arith.constant 0 : i32
    %c0_i32_2 = arith.constant 0 : i32
    return %c0_i32, %c0_i32_0, %c0_i32_1 : i32, i32, i32
  }
  func.func @transform_4(%arg0: i32) -> (i32, i32) {
    %c0_i32 = arith.constant 0 : i32
    %c0_i32_0 = arith.constant 0 : i32
    return %arg0, %c0_i32 : i32, i32
  }
}

</mosaic_0001>

<bundles_post_ra>
// kernel: tpu_custom_call.1
= control target key start
LH: loop header
LB: loop body
LE: loop exit
PB: predicated region body
PF: predicated region fallthrough
CT: control target
= control target key end

     0   :  { %9 = vsyncpa [#allocation3], 0  ;;  %s417_s0 = inlined_call_operand.hbm [shape: f32[8,32], index: 0, kind: input, shape index: {}]   ;;  %s418_s1 = inlined_call_operand.hbm [shape: f32[3,32,32], index: 1, kind: input, shape index: {}]   ;;  %s419_s2 = inlined_call_operand.hbm [shape: f32[3,1,32], index: 2, kind: input, shape index: {}]   ;;  %s420_s3 = inlined_call_operand.hbm [shape: f32[3,1,32], index: 3, kind: input, shape index: {}]   ;;  %s421_s4 = inlined_call_operand.hbm [shape: f32[8,32], index: 4, kind: output, shape index: {}]  }
   0x1   :  { %10 = vsyncpa [#allocation6], 0 }
   0x2   :  { %11 = vsyncpa [#allocation9], 0  ;;  %s28_s17 = sshll.u32 %s418_s1, 4  ;;  %s29_s17 = int_to_ptr.hbm [resolvable:$true] %s28_s17 }
   0x3   :  { %12 = vsyncpa [#allocation4], 0  ;;  %s364_s18 = smov [#allocation5]   ;;  %s18_s22 = sshll.u32 %s417_s0, 4  ;;  %s19_s22 = int_to_ptr.hbm [resolvable:$true] %s18_s22 }
   0x4   :  { %s30_s19 = sshll.u32 %s364_s18, 4  ;;  %s365_s23 = smov 128   ;;  %s31_s19 = int_to_ptr.vmem [resolvable:$true] %s30_s19 }
   0x5   :  { %s366_s24 = smov 8   ;;  %s367_s25 = smov [#allocation2]  }
   0x6   :  { %36 = dma.hbm_to_vmem [thread:$0]  %s29_s17, 1536, %s31_s19, [#allocation6], %s365_s23, %s365_s23, %s366_s24  }
   0x7   :  { %s20_s26 = sshll.u32 %s367_s25, 4  ;;  %s41_s29 = sshll.u32 %s419_s2, 4  ;;  %s21_s26 = int_to_ptr.vmem [resolvable:$true] %s20_s26  ;;  %s42_s29 = int_to_ptr.hbm [resolvable:$true] %s41_s29 }
   0x8   :  { %23 = dma.hbm_to_vmem [thread:$0]  %s19_s22, 128, %s21_s26, [#allocation3]  }
   0x9   :  { %s368_s1 = smov [#allocation7]   ;;  %s54_s0 = sshll.u32 %s420_s3, 4  ;;  %s55_s0 = int_to_ptr.hbm [resolvable:$true] %s54_s0 }
   0xa   :  { %s43_s30 = sshll.u32 %s368_s1, 4  ;;  %s369_s7 = smov 16   ;;  %s44_s30 = int_to_ptr.vmem [resolvable:$true] %s43_s30 }
   0xb   :  { %s370_s8 = smov 1   ;;  %s371_s9 = smov [#allocation8]  }
   0xc   :  { %49 = dma.hbm_to_vmem [thread:$0]  %s42_s29, 48, %s44_s30, [#allocation6], %s369_s7, %s369_s7, %s370_s8  }
   0xd   :  { %s56_s10 = sshll.u32 %s371_s9, 4  ;;  %s57_s10 = int_to_ptr.vmem [resolvable:$true] %s56_s10 }
   0xe   :  { %62 = dma.hbm_to_vmem [thread:$0]  %s55_s0, 48, %s57_s10, [#allocation9], %s369_s7, %s369_s7, %s370_s8  }
   0xf   :  { %356 = dma.done.wait [#allocation3], 128  }
  0x10   :  { %357 = vsyncadd [#allocation3], 4294967168 }
  0x11   :  { %358 = dma.done.wait [#allocation6], 1584  }
  0x12   :  { %359 = vsyncadd [#allocation6], 4294965712 }
  0x13   :  { %360 = dma.done.wait [#allocation9], 48  }
  0x14   :  { %361 = vsyncadd [#allocation9], 4294967248  ;;  %v88_v0 = vld [vmem:[#allocation5 + $0x18] sm:$0xff]  ;;  %v87_v1 = vld [vmem:[#allocation5 + $0x10] sm:$0xff]  ;;  %vm93_vm0 = vcmask 261120   ;;  %s372_s2 = smov [#allocation10]  }
  0x15   :  { %109 = vmatpush.msra.mxu0 %v88_v0  ;;  %v79_v2 = vld [vmem:[#allocation2] sm:$0xff]  ;;  %v86_v3 = vld [vmem:[#allocation5 + $0x8] sm:$0xff]  ;;  %v230_v4 = vld [vmem:[#allocation8] ss:$0 sm:$0xff]  ;;  %s204_s3 = sshll.u32 %s372_s2, 4  ;;  %s206_s13 = sshll.u32 %s421_s4, 4  ;;  %s205_s3 = int_to_ptr.vmem [resolvable:$true] %s204_s3  ;;  %s207_s13 = int_to_ptr.hbm [resolvable:$true] %s206_s13 }
  0x16   :  { %v85_v5 = vld [vmem:[#allocation5] sm:$0xff]  ;;  %v84_v6 = vmul.f32 %v230_v4, %v79_v2  ;;  %v128_v7 = vld [vmem:[#allocation5 + $0x38] sm:$0xff]  ;;  %v127_v8 = vld [vmem:[#allocation5 + $0x30] sm:$0xff] }
  0x17   :  { %110 = vmatpush.msra.mxu0 %v87_v1  ;;  %149 = vmatpush.msra.mxu1 %v128_v7  ;;  %v126_v9 = vld [vmem:[#allocation5 + $0x28] sm:$0xff]  ;;  %v125_v10 = vld [vmem:[#allocation5 + $0x20] sm:$0xff]  ;;  %v168_v17 = vld [vmem:[#allocation5 + $0x58] sm:$0xff] }
  0x18   :  { %v231_v11 = vld [vmem:[#allocation7] ss:$0 sm:$0xff]  ;;  %v232_v14 = vld [vmem:[#allocation8 + $0x1] ss:$0 sm:$0xff]  ;;  %189 = vmatpush.msra.mxu2 %v168_v17  ;;  %v167_v18 = vld [vmem:[#allocation5 + $0x50] sm:$0xff] }
  0x19   :  { %111 = vmatpush.msra.mxu0 %v86_v3  ;;  %150 = vmatpush.msra.mxu1 %v127_v8  ;;  %v166_v19 = vld [vmem:[#allocation5 + $0x48] sm:$0xff]  ;;  %v165_v20 = vld [vmem:[#allocation5 + $0x40] sm:$0xff] }
  0x1a   :  { %190 = vmatpush.msra.mxu2 %v167_v18  ;;  %v233_v21 = vld [vmem:[#allocation7 + $0x1] ss:$0 sm:$0xff]  ;;  %v234_v24 = vld [vmem:[#allocation8 + $0x2] ss:$0 sm:$0xff]  ;;  %v235_v27 = vld [vmem:[#allocation7 + $0x2] ss:$0 sm:$0xff] }
  0x1b   :  { %112 = vmatpush.msra.mxu0 %v85_v5  ;;  %151 = vmatpush.msra.mxu1 %v126_v9 }
  0x1c   :  { %218 = vmatmul.msk.f32.vlgmr.msra.gmra.mxu0 %vm93_vm0, %v84_v6  ;;  %191 = vmatpush.msra.mxu2 %v166_v19 }
  0x1d   :  { %152 = vmatpush.msra.mxu1 %v125_v10 }
  0x1e   :  { %192 = vmatpush.msra.mxu2 %v165_v20 }
  0x99   :  { %v114_v12 = vpop.f32.mrf.mxu0 }
  0x9a   :  { %v115_v13 = vadd.f32 %v231_v11, %v114_v12 }
  0x9c   :  { %v117_v15 = vadd.f32 %v115_v13, %v79_v2 }
  0x9e   :  { %v123_v16 = vmul.f32 %v232_v14, %v117_v15 }
  0xa0   :  { %219 = vmatmul.msk.f32.vlgmr.msra.gmra.mxu1 %vm93_vm0, %v123_v16 }
 0x11d   :  { %v154_v22 = vpop.f32.mrf.mxu1 }
 0x11e   :  { %v155_v23 = vadd.f32 %v233_v21, %v154_v22 }
 0x120   :  { %v157_v25 = vadd.f32 %v155_v23, %v117_v15 }
 0x122   :  { %v163_v26 = vmul.f32 %v234_v24, %v157_v25 }
 0x124   :  { %220 = vmatmul.msk.f32.vlgmr.msra.gmra.mxu2 %vm93_vm0, %v163_v26 }
 0x1a7   :  { %v194_v28 = vpop.f32.mrf.mxu2 }
 0x1a8   :  { %v195_v29 = vadd.f32 %v235_v27, %v194_v28 }
 0x1aa   :  { %v197_v30 = vadd.f32 %v195_v29, %v157_v25 }
 0x1ac   :  { %198 = vst.msk [vmem:[#allocation10] sm:$0xff] %vm93_vm0, %v197_v30 }
 0x1ad   :  { %209 = dma.vmem_to_hbm [thread:$0]  %s205_s3, 128, %s207_s13, [#allocation4]  }
 0x1ae   :  { %362 = dma.done.wait [#allocation4], 128  }
 0x1af   :  { %363 = vsyncadd [#allocation4], 4294967168 }
 0x1b0   :  { %214 = vsyncpa [#allocation3], 1 }
 0x1b1   :  { %215 = vsyncpa [#allocation6], 1 }
 0x1b2   :  { %216 = vsyncpa [#allocation9], 1 }
 0x1b3   :  { %217 = vsyncpa [#allocation4], 1 }

// kernel: tpu_custom_call.1
= control target key start
LH: loop header
LB: loop body
LE: loop exit
PB: predicated region body
PF: predicated region fallthrough
CT: control target
= control target key end

     0   :  { %9 = vsyncpa [#allocation3], 0  ;;  %s417_s0 = inlined_call_operand.hbm [shape: f32[8,32], index: 0, kind: input, shape index: {}]   ;;  %s418_s1 = inlined_call_operand.hbm [shape: f32[3,32,32], index: 1, kind: input, shape index: {}]   ;;  %s419_s2 = inlined_call_operand.hbm [shape: f32[3,1,32], index: 2, kind: input, shape index: {}]   ;;  %s420_s3 = inlined_call_operand.hbm [shape: f32[3,1,32], index: 3, kind: input, shape index: {}]   ;;  %s421_s4 = inlined_call_operand.hbm [shape: f32[8,32], index: 4, kind: output, shape index: {}]  }
   0x1   :  { %10 = vsyncpa [#allocation6], 0 }
   0x2   :  { %11 = vsyncpa [#allocation9], 0  ;;  %s28_s17 = sshll.u32 %s418_s1, 4  ;;  %s29_s17 = int_to_ptr.hbm [resolvable:$true] %s28_s17 }
   0x3   :  { %12 = vsyncpa [#allocation4], 0  ;;  %s364_s18 = smov [#allocation5]   ;;  %s18_s22 = sshll.u32 %s417_s0, 4  ;;  %s19_s22 = int_to_ptr.hbm [resolvable:$true] %s18_s22 }
   0x4   :  { %s30_s19 = sshll.u32 %s364_s18, 4  ;;  %s365_s23 = smov 128   ;;  %s31_s19 = int_to_ptr.vmem [resolvable:$true] %s30_s19 }
   0x5   :  { %s366_s24 = smov 8   ;;  %s367_s25 = smov [#allocation2]  }
   0x6   :  { %36 = dma.hbm_to_vmem [thread:$0]  %s29_s17, 1536, %s31_s19, [#allocation6], %s365_s23, %s365_s23, %s366_s24  }
   0x7   :  { %s20_s26 = sshll.u32 %s367_s25, 4  ;;  %s41_s29 = sshll.u32 %s419_s2, 4  ;;  %s21_s26 = int_to_ptr.vmem [resolvable:$true] %s20_s26  ;;  %s42_s29 = int_to_ptr.hbm [resolvable:$true] %s41_s29 }
   0x8   :  { %23 = dma.hbm_to_vmem [thread:$0]  %s19_s22, 128, %s21_s26, [#allocation3]  }
   0x9   :  { %s368_s1 = smov [#allocation7]   ;;  %s54_s0 = sshll.u32 %s420_s3, 4  ;;  %s55_s0 = int_to_ptr.hbm [resolvable:$true] %s54_s0 }
   0xa   :  { %s43_s30 = sshll.u32 %s368_s1, 4  ;;  %s369_s7 = smov 16   ;;  %s44_s30 = int_to_ptr.vmem [resolvable:$true] %s43_s30 }
   0xb   :  { %s370_s8 = smov 1   ;;  %s371_s9 = smov [#allocation8]  }
   0xc   :  { %49 = dma.hbm_to_vmem [thread:$0]  %s42_s29, 48, %s44_s30, [#allocation6], %s369_s7, %s369_s7, %s370_s8  }
   0xd   :  { %s56_s10 = sshll.u32 %s371_s9, 4  ;;  %s57_s10 = int_to_ptr.vmem [resolvable:$true] %s56_s10 }
   0xe   :  { %62 = dma.hbm_to_vmem [thread:$0]  %s55_s0, 48, %s57_s10, [#allocation9], %s369_s7, %s369_s7, %s370_s8  }
   0xf   :  { %356 = dma.done.wait [#allocation3], 128  }
  0x10   :  { %357 = vsyncadd [#allocation3], 4294967168 }
  0x11   :  { %358 = dma.done.wait [#allocation6], 1584  }
  0x12   :  { %359 = vsyncadd [#allocation6], 4294965712 }
  0x13   :  { %360 = dma.done.wait [#allocation9], 48  }
  0x14   :  { %361 = vsyncadd [#allocation9], 4294967248  ;;  %v88_v0 = vld [vmem:[#allocation5 + $0x18] sm:$0xff]  ;;  %v87_v1 = vld [vmem:[#allocation5 + $0x10] sm:$0xff]  ;;  %vm93_vm0 = vcmask 261120   ;;  %s372_s2 = smov [#allocation10]  }
  0x15   :  { %109 = vmatpush.msra.mxu0 %v88_v0  ;;  %v79_v2 = vld [vmem:[#allocation2] sm:$0xff]  ;;  %v86_v3 = vld [vmem:[#allocation5 + $0x8] sm:$0xff]  ;;  %v230_v4 = vld [vmem:[#allocation8] ss:$0 sm:$0xff]  ;;  %s204_s3 = sshll.u32 %s372_s2, 4  ;;  %s206_s13 = sshll.u32 %s421_s4, 4  ;;  %s205_s3 = int_to_ptr.vmem [resolvable:$true] %s204_s3  ;;  %s207_s13 = int_to_ptr.hbm [resolvable:$true] %s206_s13 }
  0x16   :  { %v85_v5 = vld [vmem:[#allocation5] sm:$0xff]  ;;  %v84_v6 = vmul.f32 %v230_v4, %v79_v2  ;;  %v128_v7 = vld [vmem:[#allocation5 + $0x38] sm:$0xff]  ;;  %v127_v8 = vld [vmem:[#allocation5 + $0x30] sm:$0xff] }
  0x17   :  { %110 = vmatpush.msra.mxu0 %v87_v1  ;;  %149 = vmatpush.msra.mxu1 %v128_v7  ;;  %v126_v9 = vld [vmem:[#allocation5 + $0x28] sm:$0xff]  ;;  %v125_v10 = vld [vmem:[#allocation5 + $0x20] sm:$0xff]  ;;  %v168_v17 = vld [vmem:[#allocation5 + $0x58] sm:$0xff] }
  0x18   :  { %v231_v11 = vld [vmem:[#allocation7] ss:$0 sm:$0xff]  ;;  %v232_v14 = vld [vmem:[#allocation8 + $0x1] ss:$0 sm:$0xff]  ;;  %189 = vmatpush.msra.mxu2 %v168_v17  ;;  %v167_v18 = vld [vmem:[#allocation5 + $0x50] sm:$0xff] }
  0x19   :  { %111 = vmatpush.msra.mxu0 %v86_v3  ;;  %150 = vmatpush.msra.mxu1 %v127_v8  ;;  %v166_v19 = vld [vmem:[#allocation5 + $0x48] sm:$0xff]  ;;  %v165_v20 = vld [vmem:[#allocation5 + $0x40] sm:$0xff] }
  0x1a   :  { %190 = vmatpush.msra.mxu2 %v167_v18  ;;  %v233_v21 = vld [vmem:[#allocation7 + $0x1] ss:$0 sm:$0xff]  ;;  %v234_v24 = vld [vmem:[#allocation8 + $0x2] ss:$0 sm:$0xff]  ;;  %v235_v27 = vld [vmem:[#allocation7 + $0x2] ss:$0 sm:$0xff] }
  0x1b   :  { %112 = vmatpush.msra.mxu0 %v85_v5  ;;  %151 = vmatpush.msra.mxu1 %v126_v9 }
  0x1c   :  { %218 = vmatmul.msk.f32.vlgmr.msra.gmra.mxu0 %vm93_vm0, %v84_v6  ;;  %191 = vmatpush.msra.mxu2 %v166_v19 }
  0x1d   :  { %152 = vmatpush.msra.mxu1 %v125_v10 }
  0x1e   :  { %192 = vmatpush.msra.mxu2 %v165_v20 }
  0x99   :  { %v114_v12 = vpop.f32.mrf.mxu0 }
  0x9a   :  { %v115_v13 = vadd.f32 %v231_v11, %v114_v12 }
  0x9c   :  { %v117_v15 = vadd.f32 %v115_v13, %v79_v2 }
  0x9e   :  { %v123_v16 = vmul.f32 %v232_v14, %v117_v15 }
  0xa0   :  { %219 = vmatmul.msk.f32.vlgmr.msra.gmra.mxu1 %vm93_vm0, %v123_v16 }
 0x11d   :  { %v154_v22 = vpop.f32.mrf.mxu1 }
 0x11e   :  { %v155_v23 = vadd.f32 %v233_v21, %v154_v22 }
 0x120   :  { %v157_v25 = vadd.f32 %v155_v23, %v117_v15 }
 0x122   :  { %v163_v26 = vmul.f32 %v234_v24, %v157_v25 }
 0x124   :  { %220 = vmatmul.msk.f32.vlgmr.msra.gmra.mxu2 %vm93_vm0, %v163_v26 }
 0x1a7   :  { %v194_v28 = vpop.f32.mrf.mxu2 }
 0x1a8   :  { %v195_v29 = vadd.f32 %v235_v27, %v194_v28 }
 0x1aa   :  { %v197_v30 = vadd.f32 %v195_v29, %v157_v25 }
 0x1ac   :  { %198 = vst.msk [vmem:[#allocation10] sm:$0xff] %vm93_vm0, %v197_v30 }
 0x1ad   :  { %209 = dma.vmem_to_hbm [thread:$0]  %s205_s3, 128, %s207_s13, [#allocation4]  }
 0x1ae   :  { %362 = dma.done.wait [#allocation4], 128  }
 0x1af   :  { %363 = vsyncadd [#allocation4], 4294967168 }
 0x1b0   :  { %214 = vsyncpa [#allocation3], 1 }
 0x1b1   :  { %215 = vsyncpa [#allocation6], 1 }
 0x1b2   :  { %216 = vsyncpa [#allocation9], 1 }
 0x1b3   :  { %217 = vsyncpa [#allocation4], 1 }

</bundles_post_ra>
